<compile_context>
chip_gen: v6e
topology: v6e:2x2x1
jax: 0.10.0
libtpu: 0.0.40
codegen_flags: <defaults>
</compile_context>

<pallas_src>
import math
from functools import partial

import jax
import jax.numpy as jnp
from jax.experimental import pallas as pl
from jax.experimental.pallas import tpu as pltpu

_LANE = 128
_SUBLANE = 8
# Conservative resident-set budget so the same tiling works on v5e/v6e
# (128 MiB physical VMEM) and v7x (64 MiB physical, 32 MiB scoped default).
_VMEM_BUDGET_BYTES = 40 * 1024 * 1024
_VMEM_LIMIT_CAP_BYTES = 56 * 1024 * 1024


def _round_up(v, m):
    return ((v + m - 1) // m) * m


def _round_down(v, m):
    return (v // m) * m


# ----------------------------------------------------------------------------
# Fused kernel: L2-normalize rows + matmul + bias  (lane-dense padded output)
# ----------------------------------------------------------------------------
def _l2norm_linear_kernel(x_ref, w_ref, b_ref, o_ref, *, eps, scale_after):
    # x: (tile_b, F)   w: (F, tile_n)   b: (1, tile_n)   o: (tile_b, tile_n)
    x = x_ref[...].astype(jnp.float32)
    sq = jnp.sum(x * x, axis=-1, keepdims=True)
    # torch.nn.functional.normalize(p=2, dim=1): x / clamp_min(||x||_2, eps).
    # sqrt is monotone, so 1/max(sqrt(sq), eps) == rsqrt(max(sq, eps^2));
    # rsqrt runs in the EUP slot instead of a VPU divide.
    inv = jax.lax.rsqrt(jnp.maximum(sq, eps * eps))
    w = w_ref[...]
    if scale_after:
        # Output tile narrower than F -> cheaper to scale after the matmul.
        y = jnp.dot(x, w, preferred_element_type=jnp.float32) * inv
    else:
        y = jnp.dot(x * inv, w, preferred_element_type=jnp.float32)
    o_ref[...] = (y + b_ref[...]).astype(o_ref.dtype)


# ----------------------------------------------------------------------------
# Tiling / call construction
# ----------------------------------------------------------------------------
def _choose_tiles(B, F, N_pad):
    """Pick (tile_b, tile_n, single_buffer_w) under the VMEM budget."""
    if B < 16:
        tile_b = B  # single full-extent batch block (allowed by the (8,128) rule)
    else:
        # Fixed large tile with a cdiv grid, but guarantee >= 2 batch grid
        # steps so the "parallel" batch axis can shard across v7x's two TCs.
        tile_b = min(256, _round_up(pl.cdiv(B, 2), _SUBLANE))

    def resident_bytes(tb, tn, w_bufs):
        # W tile(s) + double-buffered x tile + double-buffered out tile + bias.
        return 4 * (w_bufs * F * tn + 2 * tb * F + 2 * tb * tn + 2 * tn)

    # Preferred: whole classifier width resident, single-buffered W.
    if resident_bytes(tile_b, N_pad, 1) <= _VMEM_BUDGET_BYTES:
        return tile_b, N_pad, True

    # Otherwise tile the class dimension (double-buffered W tiles, streamed once).
    tile_n = N_pad
    while tile_n > _LANE and resident_bytes(tile_b, tile_n, 2) > _VMEM_BUDGET_BYTES:
        tile_n = max(_LANE, _round_down(tile_n // 2, _LANE))
    while tile_b > _SUBLANE and resident_bytes(tile_b, tile_n, 2) > _VMEM_BUDGET_BYTES:
        tile_b = max(_SUBLANE, _round_down(tile_b // 2, _SUBLANE))
    # NOTE: for very large feat_dim (F >= ~8K) an innermost K grid axis with a
    # VMEM accumulator would bound the working set further; unnecessary for
    # typical embedding dims.
    return tile_b, tile_n, False


def _build_call(B, F, N_pad, tile_b, tile_n, eps, scale_after, single_buffer_w,
                vmem_limit_bytes):
    # N outermost so each (F, tile_n) weight tile is DMA'd once; batch inner.
    grid = (pl.cdiv(N_pad, tile_n), pl.cdiv(B, tile_b))
    const_kwargs = {"pipeline_mode": pl.Buffered(1)} if single_buffer_w else {}
    in_specs = [
        pl.BlockSpec((tile_b, F), lambda n, b: (b, 0)),
        pl.BlockSpec((F, tile_n), lambda n, b: (0, n), **const_kwargs),
        pl.BlockSpec((1, tile_n), lambda n, b: (0, n), **const_kwargs),
    ]
    out_specs = pl.BlockSpec((tile_b, tile_n), lambda n, b: (b, n))
    cost = pl.CostEstimate(
        flops=2 * B * F * N_pad,
        bytes_accessed=4 * (B * F + F * N_pad + B * N_pad),
        transcendentals=0,
    )
    return pl.pallas_call(
        partial(_l2norm_linear_kernel, eps=eps, scale_after=scale_after),
        grid=grid,
        in_specs=in_specs,
        out_specs=out_specs,
        out_shape=jax.ShapeDtypeStruct((B, N_pad), jnp.float32),
        compiler_params=pltpu.CompilerParams(
            dimension_semantics=("arbitrary", "parallel"),
            vmem_limit_bytes=vmem_limit_bytes),
        cost_estimate=cost,
    )


# ----------------------------------------------------------------------------
# Wrapper
# ----------------------------------------------------------------------------
def l2noetf_forward(x, params, *, eps=1e-12):
    """x: (B, feat_dim) float32 -> logits (B, class_num) float32."""
    B, F = x.shape
    w_pad = params["w_pad"]          # (F, N_pad), zero-padded columns
    b_pad = params["b_pad"]          # (1, N_pad), zero-padded
    class_num = params["class_num"]  # python int
    N_pad = w_pad.shape[1]
    assert w_pad.shape[0] == F

    tile_b, tile_n, single_buffer_w = _choose_tiles(B, F, N_pad)
    scale_after = tile_n < F

    w_bufs = 1 if single_buffer_w else 2
    resident = 4 * (w_bufs * F * tile_n + 2 * tile_b * F
                    + 2 * tile_b * tile_n + 2 * tile_n)
    vmem_limit = int(min(max(resident * 5 // 4, 32 * 1024 * 1024),
                         _VMEM_LIMIT_CAP_BYTES))

    def run(single_buf):
        fn = _build_call(B, F, N_pad, tile_b, tile_n, eps, scale_after,
                         single_buf, vmem_limit)
        return fn(x, w_pad, b_pad)

    try:
        out = run(single_buffer_w)
    except Exception:
        # Fallback: if pl.Buffered(1) single-buffering is not supported by the
        # installed jax/libtpu, retry with default (double-buffered) specs.
        if not single_buffer_w:
            raise
        out = run(False)

    # Slice away the lane-padding columns -> (B, class_num) logits.
    return out[:, :class_num]


# ----------------------------------------------------------------------------
# Parameter init (deterministic; matches nn.Linear default init scheme)
# ----------------------------------------------------------------------------
def init_params(key, feat_dim, class_num):
    k_w, k_b = jax.random.split(key)
    bound = 1.0 / math.sqrt(feat_dim)
    # nn.Linear default: U(-1/sqrt(fan_in), 1/sqrt(fan_in)) for weight and bias.
    w = jax.random.uniform(k_w, (feat_dim, class_num), jnp.float32, -bound, bound)
    b = jax.random.uniform(k_b, (class_num,), jnp.float32, -bound, bound)

    n_pad = _round_up(class_num, _LANE)
    w_pad = jnp.zeros((feat_dim, n_pad), jnp.float32).at[:, :class_num].set(w)
    b_pad = jnp.zeros((1, n_pad), jnp.float32).at[0, :class_num].set(b)

    return {
        "w": w, "b": b,                   # unpadded (for reference check)
        "w_pad": w_pad, "b_pad": b_pad,   # lane-dense, used by the kernel
        "class_num": class_num,
    }


def reference_forward(x, w, b, eps=1e-12):
    """Pure-JAX reference of the PyTorch module (for the correctness assert)."""
    norm = jnp.sqrt(jnp.sum(x * x, axis=1, keepdims=True))
    xn = x / jnp.maximum(norm, eps)
    return xn @ w + b


# ----------------------------------------------------------------------------
if __name__ == "__main__":
    FEAT_DIM = 64
    CLASS_NUM = 10
    BATCH = 2

    key = jax.random.PRNGKey(0)
    k_param, k_x1, k_x2 = jax.random.split(key, 3)
    params = init_params(k_param, FEAT_DIM, CLASS_NUM)

    # Canonical small test (single grid step).
    x = jax.random.normal(k_x1, (BATCH, FEAT_DIM), dtype=jnp.float32)
    y = jax.block_until_ready(l2noetf_forward(x, params))
    assert y.shape == (BATCH, CLASS_NUM), y.shape
    assert bool(jnp.all(jnp.isfinite(y)))
    y_ref = reference_forward(x, params["w"], params["b"])
    assert jnp.allclose(y, y_ref, rtol=1e-5, atol=1e-5), \
        float(jnp.max(jnp.abs(y - y_ref)))

    # Multi-step / ragged-batch sanity check (cdiv grid + masked last block).
    x2 = jax.random.normal(k_x2, (24, FEAT_DIM), dtype=jnp.float32)
    y2 = jax.block_until_ready(l2noetf_forward(x2, params))
    assert y2.shape == (24, CLASS_NUM), y2.shape
    y2_ref = reference_forward(x2, params["w"], params["b"])
    assert jnp.allclose(y2, y2_ref, rtol=1e-5, atol=1e-5), \
        float(jnp.max(jnp.abs(y2 - y2_ref)))

    print("KERNEL_OK")
</pallas_src>

<mosaic_0001>
module attributes {stable_mosaic.version = 11 : i64} {
  func.func @_l2norm_linear_kernel(%arg0: i32, %arg1: i32, %arg2: memref<2x64xf32, #tpu.memory_space<vmem>>, %arg3: memref<64x128xf32, #tpu.memory_space<vmem>>, %arg4: memref<1x128xf32, #tpu.memory_space<vmem>>, %arg5: memref<2x128xf32, #tpu.memory_space<vmem>>) attributes {dimension_semantics = [#tpu.dimension_semantics<arbitrary>, #tpu.dimension_semantics<parallel>], iteration_bounds = array<i64: 1, 1>, scalar_prefetch = 0 : i64, scratch_operands = 0 : i64, tpu.core_type = #tpu.core_type<tc>, window_params = [{transform_indices = @transform_0, window_bounds = array<i64: 2, 64>}, {pipeline_mode = #tpu.pipeline_mode<synchronous>, transform_indices = @transform_1, window_bounds = array<i64: 64, 128>}, {pipeline_mode = #tpu.pipeline_mode<synchronous>, transform_indices = @transform_2, window_bounds = array<i64: 1, 128>}, {transform_indices = @transform_3, window_bounds = array<i64: 2, 128>}]} {
    %c0 = arith.constant 0 : index
    %c0_0 = arith.constant 0 : index
    %0 = vector.load %arg2[%c0, %c0_0] : memref<2x64xf32, #tpu.memory_space<vmem>>, vector<2x64xf32>
    %1 = arith.mulf %0, %0 : vector<2x64xf32>
    %cst = arith.constant dense<0.000000e+00> : vector<2xf32>
    %2 = vector.multi_reduction <add>, %1, %cst [1] : vector<2x64xf32> to vector<2xf32>
    %3 = vector.shape_cast %2 : vector<2xf32> to vector<2x1xf32>
    %cst_1 = arith.constant 1.000000e-24 : f32
    %4 = vector.broadcast %cst_1 : f32 to vector<2x1xf32>
    %5 = arith.maximumf %3, %4 : vector<2x1xf32>
    %6 = math.rsqrt %5 : vector<2x1xf32>
    %c0_2 = arith.constant 0 : index
    %c0_3 = arith.constant 0 : index
    %7 = vector.load %arg3[%c0_2, %c0_3] : memref<64x128xf32, #tpu.memory_space<vmem>>, vector<64x128xf32>
    %8 = vector.broadcast %6 : vector<2x1xf32> to vector<2x64xf32>
    %9 = arith.mulf %0, %8 : vector<2x64xf32>
    %cst_4 = arith.constant dense<0.000000e+00> : vector<2x128xf32>
    %10 = tpu.matmul %9, %7, %cst_4 {dimension_numbers = #tpu.dot_dimension_numbers<[1], [0], [0], [1], [0, 0, 1, 1], [], []>} : vector<2x64xf32>, vector<64x128xf32>, vector<2x128xf32> -> vector<2x128xf32>
    %c0_5 = arith.constant 0 : index
    %c0_6 = arith.constant 0 : index
    %11 = vector.load %arg4[%c0_5, %c0_6] : memref<1x128xf32, #tpu.memory_space<vmem>>, vector<1x128xf32>
    %12 = vector.broadcast %11 : vector<1x128xf32> to vector<2x128xf32>
    %13 = arith.addf %10, %12 : vector<2x128xf32>
    %c0_7 = arith.constant 0 : index
    %c0_8 = arith.constant 0 : index
    %14 = vector.load %arg5[%c0_7, %c0_8] : memref<2x128xf32, #tpu.memory_space<vmem>>, vector<2x128xf32>
    tpu.vector_store %arg5[%c0_7, %c0_8], %13 {strides = array<i32>} : memref<2x128xf32, #tpu.memory_space<vmem>>, vector<2x128xf32>,
    return
  }
  func.func @transform_0(%arg0: i32, %arg1: i32) -> (i32, i32) {
    %c0_i32 = arith.constant 0 : i32
    %c0_i32_0 = arith.constant 0 : i32
    return %arg1, %c0_i32 : i32, i32
  }
  func.func @transform_1(%arg0: i32, %arg1: i32) -> (i32, i32) {
    %c0_i32 = arith.constant 0 : i32
    %c0_i32_0 = arith.constant 0 : i32
    return %c0_i32, %arg0 : i32, i32
  }
  func.func @transform_2(%arg0: i32, %arg1: i32) -> (i32, i32) {
    %c0_i32 = arith.constant 0 : i32
    %c0_i32_0 = arith.constant 0 : i32
    return %c0_i32, %arg0 : i32, i32
  }
  func.func @transform_3(%arg0: i32, %arg1: i32) -> (i32, i32) {
    %c0_i32 = arith.constant 0 : i32
    return %arg1, %arg0 : i32, i32
  }
}

module attributes {stable_mosaic.version = 11 : i64} {
  func.func @_l2norm_linear_kernel(%arg0: i32, %arg1: i32, %arg2: memref<2x64xf32, #tpu.memory_space<vmem>>, %arg3: memref<64x128xf32, #tpu.memory_space<vmem>>, %arg4: memref<1x128xf32, #tpu.memory_space<vmem>>, %arg5: memref<2x128xf32, #tpu.memory_space<vmem>>) attributes {dimension_semantics = [#tpu.dimension_semantics<arbitrary>, #tpu.dimension_semantics<parallel>], iteration_bounds = array<i64: 1, 1>, scalar_prefetch = 0 : i64, scratch_operands = 0 : i64, tpu.core_type = #tpu.core_type<tc>, window_params = [{transform_indices = @transform_0, window_bounds = array<i64: 2, 64>}, {transform_indices = @transform_1, window_bounds = array<i64: 64, 128>}, {transform_indices = @transform_2, window_bounds = array<i64: 1, 128>}, {transform_indices = @transform_3, window_bounds = array<i64: 2, 128>}]} {
    %c0 = arith.constant 0 : index
    %c0_0 = arith.constant 0 : index
    %0 = vector.load %arg2[%c0, %c0_0] : memref<2x64xf32, #tpu.memory_space<vmem>>, vector<2x64xf32>
    %1 = arith.mulf %0, %0 : vector<2x64xf32>
    %cst = arith.constant dense<0.000000e+00> : vector<2xf32>
    %2 = vector.multi_reduction <add>, %1, %cst [1] : vector<2x64xf32> to vector<2xf32>
    %3 = vector.shape_cast %2 : vector<2xf32> to vector<2x1xf32>
    %cst_1 = arith.constant 1.000000e-24 : f32
    %4 = vector.broadcast %cst_1 : f32 to vector<2x1xf32>
    %5 = arith.maximumf %3, %4 : vector<2x1xf32>
    %6 = math.rsqrt %5 : vector<2x1xf32>
    %c0_2 = arith.constant 0 : index
    %c0_3 = arith.constant 0 : index
    %7 = vector.load %arg3[%c0_2, %c0_3] : memref<64x128xf32, #tpu.memory_space<vmem>>, vector<64x128xf32>
    %8 = vector.broadcast %6 : vector<2x1xf32> to vector<2x64xf32>
    %9 = arith.mulf %0, %8 : vector<2x64xf32>
    %cst_4 = arith.constant dense<0.000000e+00> : vector<2x128xf32>
    %10 = tpu.matmul %9, %7, %cst_4 {dimension_numbers = #tpu.dot_dimension_numbers<[1], [0], [0], [1], [0, 0, 1, 1], [], []>} : vector<2x64xf32>, vector<64x128xf32>, vector<2x128xf32> -> vector<2x128xf32>
    %c0_5 = arith.constant 0 : index
    %c0_6 = arith.constant 0 : index
    %11 = vector.load %arg4[%c0_5, %c0_6] : memref<1x128xf32, #tpu.memory_space<vmem>>, vector<1x128xf32>
    %12 = vector.broadcast %11 : vector<1x128xf32> to vector<2x128xf32>
    %13 = arith.addf %10, %12 : vector<2x128xf32>
    %c0_7 = arith.constant 0 : index
    %c0_8 = arith.constant 0 : index
    %14 = vector.load %arg5[%c0_7, %c0_8] : memref<2x128xf32, #tpu.memory_space<vmem>>, vector<2x128xf32>
    tpu.vector_store %arg5[%c0_7, %c0_8], %13 {strides = array<i32>} : memref<2x128xf32, #tpu.memory_space<vmem>>, vector<2x128xf32>,
    return
  }
  func.func @transform_0(%arg0: i32, %arg1: i32) -> (i32, i32) {
    %c0_i32 = arith.constant 0 : i32
    %c0_i32_0 = arith.constant 0 : i32
    return %arg1, %c0_i32 : i32, i32
  }
  func.func @transform_1(%arg0: i32, %arg1: i32) -> (i32, i32) {
    %c0_i32 = arith.constant 0 : i32
    %c0_i32_0 = arith.constant 0 : i32
    return %c0_i32, %arg0 : i32, i32
  }
  func.func @transform_2(%arg0: i32, %arg1: i32) -> (i32, i32) {
    %c0_i32 = arith.constant 0 : i32
    %c0_i32_0 = arith.constant 0 : i32
    return %c0_i32, %arg0 : i32, i32
  }
  func.func @transform_3(%arg0: i32, %arg1: i32) -> (i32, i32) {
    %c0_i32 = arith.constant 0 : i32
    return %arg1, %arg0 : i32, i32
  }
}

</mosaic_0001>

<bundles_post_ra>
// kernel: tpu_custom_call.1
= control target key start
LH: loop header
LB: loop body
LE: loop exit
PB: predicated region body
PF: predicated region fallthrough
CT: control target
= control target key end

     0   :  { %8 = vsyncpa [#allocation3], 0  ;;  %s300_s0 = inlined_call_operand.hbm [shape: f32[2,64], index: 0, kind: input, shape index: {}]   ;;  %s301_s1 = inlined_call_operand.hbm [shape: f32[64,128], index: 1, kind: input, shape index: {}]   ;;  %s302_s2 = inlined_call_operand.vmem [shape: f32[1,128], index: 2, kind: input, shape index: {}]   ;;  %s303_s3 = inlined_call_operand.hbm [shape: f32[2,128], index: 3, kind: output, shape index: {}]  }
   0x1   :  { %9 = vsyncpa [#allocation6], 0 }
   0x2   :  { %10 = vsyncpa [#allocation4], 0  ;;  %s261_s12 = smov [#allocation2]   ;;  %s262_s14 = smov [#allocation5]  }
   0x3   :  { %s17_s13 = sshll.u32 %s261_s12, 4  ;;  %s26_s15 = sshll.u32 %s262_s14, 4  ;;  %s18_s13 = int_to_ptr.vmem [resolvable:$true] %s17_s13  ;;  %s27_s15 = int_to_ptr.vmem [resolvable:$true] %s26_s15 }
   0x4   :  { %s203_s16 = scalar_lea.vmem %s18_s13, 32  ;;  %p208_p1 = scmp.lt.s32.totalorder %s18_s13, %s18_s13 }
   0x5   :  { %p204_p0 = scmp.ne.s32.totalorder %s18_s13, %s203_s16  ;;  %p209_p2 = scmp.lt.s32.totalorder %s203_s16, %s203_s16 }
   0x7   :  { %p210_p3 = por %p209_p2, %p208_p1 }
   0x9   :  { %p211_p4 = pnand %p210_p3, %p204_p0 }
   0xb   :  { %214 = shalt.err (!%p211_p4)
}
   0xc   :  { %20 = dma.hbm_to_vmem [thread:$0]  %s300_s0, 32, %s18_s13, [#allocation3]  }
   0xd   :  { %s223_s19 = scalar_lea.vmem %s27_s15, 1024  ;;  %p228_p6 = scmp.lt.s32.totalorder %s27_s15, %s27_s15 }
   0xe   :  { %p224_p5 = scmp.ne.s32.totalorder %s27_s15, %s223_s19  ;;  %p229_p7 = scmp.lt.s32.totalorder %s223_s19, %s223_s19 }
  0x10   :  { %p230_p8 = por %p229_p7, %p228_p6 }
  0x12   :  { %p231_p9 = pnand %p230_p8, %p224_p5 }
  0x14   :  { %234 = shalt.err (!%p231_p9)
}
  0x15   :  { %s263_s20 = smov 128   ;;  %s264_s21 = smov 8  }
  0x16   :  { %32 = dma.hbm_to_vmem [thread:$0]  %s301_s1, 1024, %s27_s15, [#allocation6], %s263_s20, %s263_s20, %s264_s21  }
  0x17   :  { %255 = dma.done.wait [#allocation3], 32  }
  0x18   :  { %256 = vsyncadd [#allocation3], 4294967264 }
  0x19   :  { %257 = dma.done.wait [#allocation6], 1024  }
  0x1a   :  { %258 = vsyncadd [#allocation6], 4294966272  ;;  %v41_v0 = vld [vmem:[#allocation2] sm:$0x3]  ;;  %vm43_vm0 = vcmask 517120   ;;  %v265_v3 = vmov 0.0  }
  0x1b   :  { %v42_v1 = vmul.f32 %v41_v0, %v41_v0  ;;  %167 = vmatprep.subr.mxu0 %v265_v3  ;;  %v56_v4 = vld [vmem:[#allocation5 + $0x38] sm:$0xff]  ;;  %v55_v5 = vld [vmem:[#allocation5 + $0x30] sm:$0xff]  ;;  %vm266_vm1 = vmmov 0   ;;  %v54_v6 = vld [vmem:[#allocation5 + $0x28] sm:$0xff]  ;;  %vm65_vm2 = vcmask 523264   ;;  %s267_s24 = smov [#allocation7]  }
  0x1c   :  { %168 = vmatpush3.msra.mxu0 %v56_v4  ;;  %183 = vmatprep.mubr.msk.f32.mxu0 %vm266_vm1, %v265_v3  ;;  %v53_v7 = vld [vmem:[#allocation5 + $0x20] sm:$0xff]  ;;  %v52_v8 = vld [vmem:[#allocation5 + $0x18] sm:$0xff]  ;;  %v51_v9 = vld [vmem:[#allocation5 + $0x10] sm:$0xff]  ;;  %s146_s25 = sshll.u32 %s267_s24, 4  ;;  %s147_s25 = int_to_ptr.vmem [resolvable:$true] %s146_s25 }
  0x1d   :  { %v44_v2 = vsel %vm43_vm0, %v42_v1, 0.0  ;;  %169 = vmatprep.subr.mxu0 %v265_v3  ;;  %v50_v10 = vld [vmem:[#allocation5 + $0x8] sm:$0xff]  ;;  %v49_v11 = vld [vmem:[#allocation5] sm:$0xff]  ;;  %v156_v16 = vld [vmem:[%s302_s2] ss:$0 sm:$0xff]  ;;  %s235_s26 = scalar_lea.vmem %s147_s25, 32  ;;  %p240_p11 = scmp.lt.s32.totalorder %s147_s25, %s147_s25 }
  0x1e   :  { %45 = vadd.xlane.f32.xlu0 %v44_v2  ;;  %170 = vmatpush3.msra.mxu0 %v55_v5  ;;  %p236_p10 = scmp.ne.s32.totalorder %s147_s25, %s235_s26  ;;  %p241_p12 = scmp.lt.s32.totalorder %s235_s26, %s235_s26 }
  0x1f   :  { %171 = vmatprep.subr.mxu0 %v265_v3 }
  0x20   :  { %172 = vmatpush3.msra.mxu0 %v54_v6  ;;  %p242_p13 = por %p241_p12, %p240_p11 }
  0x21   :  { %173 = vmatprep.subr.mxu0 %v265_v3 }
  0x22   :  { %174 = vmatpush3.msra.mxu0 %v53_v7  ;;  %p243_p0 = pnand %p242_p13, %p236_p10 }
  0x23   :  { %175 = vmatprep.subr.mxu0 %v265_v3 }
  0x24   :  { %176 = vmatpush3.msra.mxu0 %v52_v8 }
  0x25   :  { %177 = vmatprep.subr.mxu0 %v265_v3 }
  0x26   :  { %178 = vmatpush3.msra.mxu0 %v51_v9 }
  0x27   :  { %179 = vmatprep.subr.mxu0 %v265_v3 }
  0x28   :  { %180 = vmatpush3.msra.mxu0 %v50_v10 }
  0x29   :  { %181 = vmatprep.subr.mxu0 %v265_v3 }
  0x2a   :  { %182 = vmatpush3.msra.mxu0 %v49_v11 }
  0xa7   :  { %v46_v12 = vpop.xlane.xlu0 %45 }
  0xa8   :  { %v47_v13 = vmax.f32 %v46_v12, 1e-24 }
  0xaa   :  { %193 = vrsqrt.f32 %v47_v13 }
  0xb7   :  { %v194_v14 = vpop.eup %193 }
  0xb8   :  { %v57_v15 = vmul.f32 %v194_v14, %v41_v0 }
  0xba   :  { %184 = vmatmul.mubr.msk.f32.vlgmr.msra.gmra.mxu0 %vm65_vm2, %v57_v15 }
 0x17a   :  { %v135_v17 = vpop.f32.mrf.mxu0 }
 0x17b   :  { %v136_v18 = vadd.f32 %v156_v16, %v135_v17 }
 0x17c   :  { %v185_v19 = vpop.f32.mrf.mxu0 }
 0x17d   :  { %139 = vst [vmem:[#allocation7] sm:$0x3] %v136_v18 }
 0x17e   :  { %246 = shalt.err (!%p243_p0)
}
 0x17f   :  { %149 = dma.vmem_to_hbm [thread:$0]  %s147_s25, 32, %s303_s3, [#allocation4]  }
 0x180   :  { %259 = dma.done.wait [#allocation4], 32  }
 0x181   :  { %260 = vsyncadd [#allocation4], 4294967264 }
 0x182   :  { %153 = vsyncpa [#allocation3], 1 }
 0x183   :  { %154 = vsyncpa [#allocation6], 1 }
 0x184   :  { %155 = vsyncpa [#allocation4], 1 }

// kernel: tpu_custom_call.1
= control target key start
LH: loop header
LB: loop body
LE: loop exit
PB: predicated region body
PF: predicated region fallthrough
CT: control target
= control target key end

     0   :  { %8 = vsyncpa [#allocation3], 0  ;;  %s300_s0 = inlined_call_operand.hbm [shape: f32[2,64], index: 0, kind: input, shape index: {}]   ;;  %s301_s1 = inlined_call_operand.hbm [shape: f32[64,128], index: 1, kind: input, shape index: {}]   ;;  %s302_s2 = inlined_call_operand.vmem [shape: f32[1,128], index: 2, kind: input, shape index: {}]   ;;  %s303_s3 = inlined_call_operand.hbm [shape: f32[2,128], index: 3, kind: output, shape index: {}]  }
   0x1   :  { %9 = vsyncpa [#allocation6], 0 }
   0x2   :  { %10 = vsyncpa [#allocation4], 0  ;;  %s261_s12 = smov [#allocation2]   ;;  %s262_s14 = smov [#allocation5]  }
   0x3   :  { %s17_s13 = sshll.u32 %s261_s12, 4  ;;  %s26_s15 = sshll.u32 %s262_s14, 4  ;;  %s18_s13 = int_to_ptr.vmem [resolvable:$true] %s17_s13  ;;  %s27_s15 = int_to_ptr.vmem [resolvable:$true] %s26_s15 }
   0x4   :  { %s203_s16 = scalar_lea.vmem %s18_s13, 32  ;;  %p208_p1 = scmp.lt.s32.totalorder %s18_s13, %s18_s13 }
   0x5   :  { %p204_p0 = scmp.ne.s32.totalorder %s18_s13, %s203_s16  ;;  %p209_p2 = scmp.lt.s32.totalorder %s203_s16, %s203_s16 }
   0x7   :  { %p210_p3 = por %p209_p2, %p208_p1 }
   0x9   :  { %p211_p4 = pnand %p210_p3, %p204_p0 }
   0xb   :  { %214 = shalt.err (!%p211_p4)
}
   0xc   :  { %20 = dma.hbm_to_vmem [thread:$0]  %s300_s0, 32, %s18_s13, [#allocation3]  }
   0xd   :  { %s223_s19 = scalar_lea.vmem %s27_s15, 1024  ;;  %p228_p6 = scmp.lt.s32.totalorder %s27_s15, %s27_s15 }
   0xe   :  { %p224_p5 = scmp.ne.s32.totalorder %s27_s15, %s223_s19  ;;  %p229_p7 = scmp.lt.s32.totalorder %s223_s19, %s223_s19 }
  0x10   :  { %p230_p8 = por %p229_p7, %p228_p6 }
  0x12   :  { %p231_p9 = pnand %p230_p8, %p224_p5 }
  0x14   :  { %234 = shalt.err (!%p231_p9)
}
  0x15   :  { %s263_s20 = smov 128   ;;  %s264_s21 = smov 8  }
  0x16   :  { %32 = dma.hbm_to_vmem [thread:$0]  %s301_s1, 1024, %s27_s15, [#allocation6], %s263_s20, %s263_s20, %s264_s21  }
  0x17   :  { %255 = dma.done.wait [#allocation3], 32  }
  0x18   :  { %256 = vsyncadd [#allocation3], 4294967264 }
  0x19   :  { %257 = dma.done.wait [#allocation6], 1024  }
  0x1a   :  { %258 = vsyncadd [#allocation6], 4294966272  ;;  %v41_v0 = vld [vmem:[#allocation2] sm:$0x3]  ;;  %vm43_vm0 = vcmask 517120   ;;  %v265_v3 = vmov 0.0  }
  0x1b   :  { %v42_v1 = vmul.f32 %v41_v0, %v41_v0  ;;  %167 = vmatprep.subr.mxu0 %v265_v3  ;;  %v56_v4 = vld [vmem:[#allocation5 + $0x38] sm:$0xff]  ;;  %v55_v5 = vld [vmem:[#allocation5 + $0x30] sm:$0xff]  ;;  %vm266_vm1 = vmmov 0   ;;  %v54_v6 = vld [vmem:[#allocation5 + $0x28] sm:$0xff]  ;;  %vm65_vm2 = vcmask 523264   ;;  %s267_s24 = smov [#allocation7]  }
  0x1c   :  { %168 = vmatpush3.msra.mxu0 %v56_v4  ;;  %183 = vmatprep.mubr.msk.f32.mxu0 %vm266_vm1, %v265_v3  ;;  %v53_v7 = vld [vmem:[#allocation5 + $0x20] sm:$0xff]  ;;  %v52_v8 = vld [vmem:[#allocation5 + $0x18] sm:$0xff]  ;;  %v51_v9 = vld [vmem:[#allocation5 + $0x10] sm:$0xff]  ;;  %s146_s25 = sshll.u32 %s267_s24, 4  ;;  %s147_s25 = int_to_ptr.vmem [resolvable:$true] %s146_s25 }
  0x1d   :  { %v44_v2 = vsel %vm43_vm0, %v42_v1, 0.0  ;;  %169 = vmatprep.subr.mxu0 %v265_v3  ;;  %v50_v10 = vld [vmem:[#allocation5 + $0x8] sm:$0xff]  ;;  %v49_v11 = vld [vmem:[#allocation5] sm:$0xff]  ;;  %v156_v16 = vld [vmem:[%s302_s2] ss:$0 sm:$0xff]  ;;  %s235_s26 = scalar_lea.vmem %s147_s25, 32  ;;  %p240_p11 = scmp.lt.s32.totalorder %s147_s25, %s147_s25 }
  0x1e   :  { %45 = vadd.xlane.f32.xlu0 %v44_v2  ;;  %170 = vmatpush3.msra.mxu0 %v55_v5  ;;  %p236_p10 = scmp.ne.s32.totalorder %s147_s25, %s235_s26  ;;  %p241_p12 = scmp.lt.s32.totalorder %s235_s26, %s235_s26 }
  0x1f   :  { %171 = vmatprep.subr.mxu0 %v265_v3 }
  0x20   :  { %172 = vmatpush3.msra.mxu0 %v54_v6  ;;  %p242_p13 = por %p241_p12, %p240_p11 }
  0x21   :  { %173 = vmatprep.subr.mxu0 %v265_v3 }
  0x22   :  { %174 = vmatpush3.msra.mxu0 %v53_v7  ;;  %p243_p0 = pnand %p242_p13, %p236_p10 }
  0x23   :  { %175 = vmatprep.subr.mxu0 %v265_v3 }
  0x24   :  { %176 = vmatpush3.msra.mxu0 %v52_v8 }
  0x25   :  { %177 = vmatprep.subr.mxu0 %v265_v3 }
  0x26   :  { %178 = vmatpush3.msra.mxu0 %v51_v9 }
  0x27   :  { %179 = vmatprep.subr.mxu0 %v265_v3 }
  0x28   :  { %180 = vmatpush3.msra.mxu0 %v50_v10 }
  0x29   :  { %181 = vmatprep.subr.mxu0 %v265_v3 }
  0x2a   :  { %182 = vmatpush3.msra.mxu0 %v49_v11 }
  0xa7   :  { %v46_v12 = vpop.xlane.xlu0 %45 }
  0xa8   :  { %v47_v13 = vmax.f32 %v46_v12, 1e-24 }
  0xaa   :  { %193 = vrsqrt.f32 %v47_v13 }
  0xb7   :  { %v194_v14 = vpop.eup %193 }
  0xb8   :  { %v57_v15 = vmul.f32 %v194_v14, %v41_v0 }
  0xba   :  { %184 = vmatmul.mubr.msk.f32.vlgmr.msra.gmra.mxu0 %vm65_vm2, %v57_v15 }
 0x17a   :  { %v135_v17 = vpop.f32.mrf.mxu0 }
 0x17b   :  { %v136_v18 = vadd.f32 %v156_v16, %v135_v17 }
 0x17c   :  { %v185_v19 = vpop.f32.mrf.mxu0 }
 0x17d   :  { %139 = vst [vmem:[#allocation7] sm:$0x3] %v136_v18 }
 0x17e   :  { %246 = shalt.err (!%p243_p0)
}
 0x17f   :  { %149 = dma.vmem_to_hbm [thread:$0]  %s147_s25, 32, %s303_s3, [#allocation4]  }
 0x180   :  { %259 = dma.done.wait [#allocation4], 32  }
 0x181   :  { %260 = vsyncadd [#allocation4], 4294967264 }
 0x182   :  { %153 = vsyncpa [#allocation3], 1 }
 0x183   :  { %154 = vsyncpa [#allocation6], 1 }
 0x184   :  { %155 = vsyncpa [#allocation4], 1 }

</bundles_post_ra>
